<compile_context>
chip_gen: v7x
topology: tpu7x:2x2x1
jax: 0.10.0
libtpu: 0.0.40
codegen_flags: <defaults>
</compile_context>

<pallas_src>
import functools
import math

import jax
import jax.numpy as jnp
from jax.experimental import pallas as pl
from jax.experimental.pallas import tpu as pltpu


def _round_up(x, m):
    return (x + m - 1) // m * m


def _pick_tile(size, candidates):
    for c in candidates:
        if size % c == 0:
            return c
    return size


# --------------------------------------------------------------------------
# Fused matmul kernel:  out = act((A @ B) * scale + bias)
# A, B are bf16; accumulator and epilogue are f32.
# --------------------------------------------------------------------------
def _fused_matmul_kernel(a_ref, b_ref, s_ref, c_ref, o_ref, acc_ref, *, relu):
    k = pl.program_id(2)

    @pl.when(k == 0)
    def _():
        acc_ref[...] = jnp.zeros_like(acc_ref)

    acc_ref[...] += jnp.dot(a_ref[...], b_ref[...],
                            preferred_element_type=jnp.float32)

    @pl.when(k == pl.num_programs(2) - 1)
    def _():
        y = acc_ref[...] * s_ref[...] + c_ref[...]
        if relu:
            y = jnp.maximum(y, 0.0)
        o_ref[...] = y.astype(o_ref.dtype)


def fused_matmul(a, w_p, s_p, b_p, *, n_out, relu, out_dtype=jnp.bfloat16):
    """a: (M, K) unpadded activations.  w_p: (Kp, Np) bf16, pre-padded at init.
       s_p/b_p: (1, Np) f32 folded-BN scale/bias.  Returns (M, n_out)."""
    a = a.astype(jnp.bfloat16)
    M, K = a.shape
    Kp, Np = w_p.shape
    Mp = _round_up(M, 16)                      # bf16 sublane packing
    if (Mp, Kp) != (M, K):
        a = jnp.pad(a, ((0, Mp - M), (0, Kp - K)))

    tm = _pick_tile(Mp, (256, 128, 64, 32, 16))
    tn = _pick_tile(Np, (256, 128))
    tk = _pick_tile(Kp, (2048, 1024, 512, 256, 128))
    # keep >=2 parallel grid blocks when cheaply possible (v7x: 2 TCs/chip)
    if Mp // tm == 1 and Np // tn == 1 and Np >= 256:
        tn = 128
    grid = (Mp // tm, Np // tn, Kp // tk)

    cost = pl.CostEstimate(
        flops=2 * Mp * Np * Kp,
        transcendentals=0,
        bytes_accessed=2 * (Mp * Kp + Kp * Np)
        + Mp * Np * jnp.dtype(out_dtype).itemsize)

    out = pl.pallas_call(
        functools.partial(_fused_matmul_kernel, relu=relu),
        out_shape=jax.ShapeDtypeStruct((Mp, Np), out_dtype),
        grid_spec=pltpu.PrefetchScalarGridSpec(
            num_scalar_prefetch=0,
            grid=grid,
            in_specs=[
                pl.BlockSpec((tm, tk), lambda i, j, k: (i, k)),
                pl.BlockSpec((tk, tn), lambda i, j, k: (k, j)),
                pl.BlockSpec((1, tn), lambda i, j, k: (0, j)),
                pl.BlockSpec((1, tn), lambda i, j, k: (0, j)),
            ],
            out_specs=pl.BlockSpec((tm, tn), lambda i, j, k: (i, j)),
            scratch_shapes=[pltpu.VMEM((tm, tn), jnp.float32)],
        ),
        compiler_params=pltpu.CompilerParams(
            dimension_semantics=("parallel", "parallel", "arbitrary")),
        cost_estimate=cost,
    )(a, w_p, s_p, b_p)
    return out[:M, :n_out]


# --------------------------------------------------------------------------
# im2col glue (plain XLA), conv / deconv / linear wrappers
# --------------------------------------------------------------------------
def _im2col(x, kh, kw, stride, pad):
    N, H, W, C = x.shape
    Ho = (H + 2 * pad - kh) // stride + 1
    Wo = (W + 2 * pad - kw) // stride + 1
    if pad:
        x = jnp.pad(x, ((0, 0), (pad, pad), (pad, pad), (0, 0)))
    cols = []
    for i in range(kh):
        for j in range(kw):
            cols.append(x[:, i:i + stride * Ho:stride, j:j + stride * Wo:stride, :])
    pat = jnp.concatenate(cols, axis=-1)        # (N, Ho, Wo, kh*kw*C)
    return pat.reshape(N * Ho * Wo, kh * kw * C), Ho, Wo


def conv_bn(x, p, *, stride=2, pad=1, out_dtype=jnp.bfloat16):
    """Conv2d(k=4, s=2, p=1) + folded BN + ReLU.  x: (B, H, W, Cin) bf16."""
    B = x.shape[0]
    cin_p = p["cin_p"]
    if x.shape[-1] != cin_p:
        x = jnp.pad(x, ((0, 0), (0, 0), (0, 0), (0, cin_p - x.shape[-1])))
    patches, Ho, Wo = _im2col(x, p["kh"], p["kw"], stride, pad)
    out = fused_matmul(patches, p["w"], p["s"], p["b"],
                       n_out=p["n"], relu=p["relu"], out_dtype=out_dtype)
    return out.reshape(B, Ho, Wo, p["n"])


def deconv_bn(x, p, *, out_dtype=jnp.bfloat16):
    """ConvTranspose2d(k=4, s=2, p=1) + folded BN + ReLU.
    Implemented as stride-2 zero insertion + pad (k-1-p)=2 + stride-1 conv;
    the stored HWIO weight is the (spatially flipped) equivalent conv kernel."""
    B, H, W, C = x.shape
    cin_p = p["cin_p"]
    xd = jnp.zeros((B, 2 * H + 3, 2 * W + 3, cin_p), x.dtype)
    xd = xd.at[:, 2:2 * H + 1:2, 2:2 * W + 1:2, :C].set(x)
    patches, Ho, Wo = _im2col(xd, 4, 4, 1, 0)   # Ho = 2H, Wo = 2W
    out = fused_matmul(patches, p["w"], p["s"], p["b"],
                       n_out=p["n"], relu=p["relu"], out_dtype=out_dtype)
    return out.reshape(B, Ho, Wo, p["n"])


def linear_bn(x, p, *, out_dtype=jnp.bfloat16):
    return fused_matmul(x, p["w"], p["s"], p["b"],
                        n_out=p["n"], relu=p["relu"], out_dtype=out_dtype)


# --------------------------------------------------------------------------
# Deterministic parameter init (He), BN folded (inference mode), padded once.
# --------------------------------------------------------------------------
def _fold_bn(key, c, eps=1e-5):
    k1, k2, k3, k4 = jax.random.split(key, 4)
    gamma = 1.0 + 0.1 * jax.random.normal(k1, (c,), jnp.float32)
    beta = 0.1 * jax.random.normal(k2, (c,), jnp.float32)
    mean = 0.1 * jax.random.normal(k3, (c,), jnp.float32)
    var = 1.0 + 0.1 * jax.random.uniform(k4, (c,), jnp.float32)
    scale = gamma / jnp.sqrt(var + eps)
    bias = beta - mean * scale
    return scale, bias


def _pad_sb(scale, bias, n):
    np_ = _round_up(n, 128)
    s_p = jnp.zeros((1, np_), jnp.float32).at[0, :n].set(scale)
    b_p = jnp.zeros((1, np_), jnp.float32).at[0, :n].set(bias)
    return s_p, b_p


def prep_conv(key, cin, cout, *, kh=4, kw=4, with_bn=True, relu=True):
    k_w, k_b = jax.random.split(key)
    std = math.sqrt(2.0 / (kh * kw * cin))
    w = jax.random.normal(k_w, (kh, kw, cin, cout), jnp.float32) * std
    cin_p = _round_up(cin, 8)                   # keeps K a multiple of 128
    K = kh * kw * cin_p
    Kp = _round_up(K, 128)
    Np = _round_up(cout, 128)
    w_full = jnp.zeros((kh, kw, cin_p, cout), jnp.float32).at[:, :, :cin, :].set(w)
    w2d = w_full.reshape(K, cout).astype(jnp.bfloat16)
    w_p = jnp.zeros((Kp, Np), jnp.bfloat16).at[:K, :cout].set(w2d)
    if with_bn:
        scale, bias = _fold_bn(k_b, cout)
    else:
        scale = jnp.ones((cout,), jnp.float32)
        bias = jnp.zeros((cout,), jnp.float32)
    s_p, b_p = _pad_sb(scale, bias, cout)
    return {"w": w_p, "s": s_p, "b": b_p, "n": cout,
            "cin": cin, "cin_p": cin_p, "kh": kh, "kw": kw, "relu": relu}


def prep_linear(key, k, n, *, with_bn=True, relu=True):
    k_w, k_b = jax.random.split(key)
    std = math.sqrt(2.0 / k)
    w = jax.random.normal(k_w, (k, n), jnp.float32) * std
    Kp, Np = _round_up(k, 128), _round_up(n, 128)
    w_p = jnp.zeros((Kp, Np), jnp.bfloat16).at[:k, :n].set(w.astype(jnp.bfloat16))
    if with_bn:
        scale, bias = _fold_bn(k_b, n)
    else:
        scale = jnp.ones((n,), jnp.float32)
        bias = 0.01 * jax.random.normal(k_b, (n,), jnp.float32)
    s_p, b_p = _pad_sb(scale, bias, n)
    return {"w": w_p, "s": s_p, "b": b_p, "n": n, "k": k, "relu": relu}


# --------------------------------------------------------------------------
# Ego3DAutoEncoder configuration & parameters
# (opt: num_heatmap=7, num_rot_heatmap=6, heatmap_type='gaussian',
#  use_limb_heatmap=False, joint_preset='UnrealEgo', ae_hidden_size=20;
#  input_channel_scale=2 (stereo), fc_dim=16384 -> 64x64 input, WH=8.)
# --------------------------------------------------------------------------
def make_config():
    num_heatmap = 7
    num_rot_heatmap = 6
    limb_dim = 1                                  # get_limb_dim(opt)
    ics = 2                                       # input_channel_scale
    hidden = 20
    fc_dim = 16384
    nr_total = num_rot_heatmap * limb_dim
    return dict(
        num_heatmap=num_heatmap, num_rot_heatmap=num_rot_heatmap,
        limb_dim=limb_dim, ics=ics,
        num_rot_hm_total=nr_total,
        channels_heatmap=(num_heatmap + nr_total) * ics,
        num_joints=num_heatmap + 1,
        pose_dim=(num_heatmap + 1) * 3,
        rot_dim=num_rot_heatmap * 3,
        hidden=hidden, rot_hidden=10,
        fc_dim=fc_dim, WH=int(math.sqrt(fc_dim / 256)),
    )


def init_params(key, cfg):
    ks = jax.random.split(key, 24)
    ch = cfg["channels_heatmap"]
    hid = cfg["hidden"]
    rot_in_ch = cfg["ics"] * cfg["limb_dim"]      # rot_decoder_hm_ch
    return {
        # main encoder
        "conv1": prep_conv(ks[0], ch, 64),
        "conv2": prep_conv(ks[1], 64, 128),
        "conv3": prep_conv(ks[2], 128, 256),
        "fc1": prep_linear(ks[3], cfg["fc_dim"], 2048),
        "fc2": prep_linear(ks[4], 2048, 512),
        "fc3": prep_linear(ks[5], 512, hid),
        # rot encoder
        "rot_conv1": prep_conv(ks[6], rot_in_ch, 64),
        "rot_conv2": prep_conv(ks[7], 64, 128),
        "rot_conv3": prep_conv(ks[8], 128, 256),
        "rot_fc1": prep_linear(ks[9], 256 * 8 * 8, 2048),
        "rot_fc2": prep_linear(ks[10], 2048, 512),
        "rot_fc3": prep_linear(ks[11], 512, cfg["rot_hidden"]),
        # rot MLP decoder (10 -> 32 -> 32 -> 3)
        "rot_mlp_fc1": prep_linear(ks[12], cfg["rot_hidden"], 32),
        "rot_mlp_fc2": prep_linear(ks[13], 32, 32),
        "rot_mlp_fc3": prep_linear(ks[14], 32, 3, with_bn=False, relu=False),
        # pose MLP decoder (hidden + rot_dim -> 32 -> 32 -> pose_dim)
        "pose_mlp_fc1": prep_linear(ks[15], hid + cfg["rot_dim"], 32),
        "pose_mlp_fc2": prep_linear(ks[16], 32, 32),
        "pose_mlp_fc3": prep_linear(ks[17], 32, cfg["pose_dim"],
                                    with_bn=False, relu=False),
        # heatmap decoder
        "heatmap_fc1": prep_linear(ks[18], hid, 512),
        "heatmap_fc2": prep_linear(ks[19], 512, 2048),
        "heatmap_fc3": prep_linear(ks[20], 2048, cfg["fc_dim"]),
        "deconv1": prep_conv(ks[21], 256, 128),
        "deconv2": prep_conv(ks[22], 128, 64),
        "deconv3": prep_conv(ks[23], 64, ch),
    }


# --------------------------------------------------------------------------
# Forward pass (matches Ego3DAutoEncoder.forward, pose_only=False)
# --------------------------------------------------------------------------
def ego3d_forward(x_nchw, params, cfg):
    B, _, H, W = x_nchw.shape
    x = jnp.transpose(x_nchw, (0, 2, 3, 1)).astype(jnp.bfloat16)   # NHWC bf16

    # ---- main encoder ----
    h = conv_bn(x, params["conv1"])
    h = conv_bn(h, params["conv2"])
    h = conv_bn(h, params["conv3"])                       # (B, 8, 8, 256)
    flat = jnp.transpose(h, (0, 3, 1, 2)).reshape(B, -1)  # NCHW flatten order
    h = linear_bn(flat, params["fc1"])
    h = linear_bn(h, params["fc2"])
    z = linear_bn(h, params["fc3"])                       # (B, hidden)

    # ---- limb-heatmap regrouping (limb_heatmap_dim != 0 branch) ----
    nr, ics, ld = cfg["num_rot_hm_total"], cfg["ics"], cfg["limb_dim"]
    limb = x_nchw[:, -nr * ics:]                          # (B, nr*ics, H, W)
    left, right = jnp.split(limb, 2, axis=1)
    left = left.reshape(B, ld, -1, H, W)
    right = right.reshape(B, ld, -1, H, W)
    limb_hm = jnp.concatenate([left, right], axis=1)
    limb_hm = jnp.swapaxes(limb_hm, 1, 2)
    limb_hm = limb_hm.reshape(-1, limb_hm.shape[2], H, W)
    rh = jnp.transpose(limb_hm, (0, 2, 3, 1)).astype(jnp.bfloat16)

    # ---- rot encoder ----
    r = conv_bn(rh, params["rot_conv1"])
    r = conv_bn(r, params["rot_conv2"])
    r = conv_bn(r, params["rot_conv3"])                   # (B*nlimb, 8, 8, 256)
    rflat = jnp.transpose(r, (0, 3, 1, 2)).reshape(r.shape[0], -1)
    r = linear_bn(rflat, params["rot_fc1"])
    r = linear_bn(r, params["rot_fc2"])
    rot_z = linear_bn(r, params["rot_fc3"])

    m = linear_bn(rot_z, params["rot_mlp_fc1"])
    m = linear_bn(m, params["rot_mlp_fc2"])
    rot = linear_bn(m, params["rot_mlp_fc3"], out_dtype=jnp.float32)
    rot = rot.reshape(B, -1)                              # (B, rot_dim)

    # ---- pose decoder ----
    z_bar = jnp.concatenate(
        [z.astype(jnp.float32), jax.lax.stop_gradient(rot)], axis=-1)
    pz = linear_bn(z_bar, params["pose_mlp_fc1"])
    pz = linear_bn(pz, params["pose_mlp_fc2"])
    pose = linear_bn(pz, params["pose_mlp_fc3"], out_dtype=jnp.float32)
    output_pose = pose.reshape(B, cfg["num_joints"], 3)

    # ---- heatmap decoder ----
    hm = linear_bn(z, params["heatmap_fc1"])
    hm = linear_bn(hm, params["heatmap_fc2"])
    hm = linear_bn(hm, params["heatmap_fc3"])             # (B, fc_dim)
    wh = cfg["WH"]
    hm = hm.reshape(B, 256, wh, wh)                       # matches .view(B,256,WH,WH)
    hm = jnp.transpose(hm, (0, 2, 3, 1))                  # NHWC
    hm = deconv_bn(hm, params["deconv1"])
    hm = deconv_bn(hm, params["deconv2"])
    hm = deconv_bn(hm, params["deconv3"], out_dtype=jnp.float32)
    output_hm = jnp.transpose(hm, (0, 3, 1, 2))           # NCHW

    return output_pose, rot, output_hm


if __name__ == "__main__":
    cfg = make_config()
    key = jax.random.PRNGKey(0)
    kx, kp = jax.random.split(key)
    B = 2
    # spatial must be 64x64: rot_fc1's input is hard-wired to 256*8*8 after
    # three stride-2 convs (and fc_dim=16384 matches the same geometry).
    x = jax.random.normal(kx, (B, cfg["channels_heatmap"], 64, 64), jnp.float32)
    params = init_params(kp, cfg)

    pose, rot, hm = jax.block_until_ready(ego3d_forward(x, params, cfg))

    assert pose.shape == (B, cfg["num_joints"], 3), pose.shape
    assert rot.shape == (B, cfg["rot_dim"]), rot.shape
    assert hm.shape == (B, cfg["channels_heatmap"], 64, 64), hm.shape
    assert all(bool(jnp.all(jnp.isfinite(o))) for o in (pose, rot, hm))
    print("KERNEL_OK")
</pallas_src>

<mosaic_0001>
module attributes {stable_mosaic.version = 11 : i64} {
  func.func @_fused_matmul_kernel(%arg0: i32, %arg1: i32, %arg2: i32, %arg3: memref<256x512xbf16, #tpu.memory_space<vmem>>, %arg4: memref<512x128xbf16, #tpu.memory_space<vmem>>, %arg5: memref<1x128xf32, #tpu.memory_space<vmem>>, %arg6: memref<1x128xf32, #tpu.memory_space<vmem>>, %arg7: memref<256x128xbf16, #tpu.memory_space<vmem>>, %arg8: memref<256x128xf32, #tpu.memory_space<vmem>>) attributes {dimension_semantics = [#tpu.dimension_semantics<parallel>, #tpu.dimension_semantics<parallel>, #tpu.dimension_semantics<arbitrary>], iteration_bounds = array<i64: 8, 1, 1>, scalar_prefetch = 0 : i64, scratch_operands = 1 : i64, tpu.core_type = #tpu.core_type<tc>, window_params = [{transform_indices = @transform_0, window_bounds = array<i64: 256, 512>}, {transform_indices = @transform_1, window_bounds = array<i64: 512, 128>}, {transform_indices = @transform_2, window_bounds = array<i64: 1, 128>}, {transform_indices = @transform_3, window_bounds = array<i64: 1, 128>}, {transform_indices = @transform_4, window_bounds = array<i64: 256, 128>}]} {
    %c0_i32 = arith.constant 0 : i32
    %0 = arith.cmpi eq, %arg2, %c0_i32 : i32
    %1 = arith.extui %0 : i1 to i32
    %c0_i32_0 = arith.constant 0 : i32
    %2 = arith.cmpi ne, %1, %c0_i32_0 : i32
    scf.if %2 {
      %cst_10 = arith.constant 0.000000e+00 : f32
      %12 = vector.broadcast %cst_10 : f32 to vector<256x128xf32>
      %c0_11 = arith.constant 0 : index
      %c0_12 = arith.constant 0 : index
      %13 = vector.load %arg8[%c0_11, %c0_12] : memref<256x128xf32, #tpu.memory_space<vmem>>, vector<256x128xf32>
      tpu.vector_store %arg8[%c0_11, %c0_12], %12 {strides = array<i32>} : memref<256x128xf32, #tpu.memory_space<vmem>>, vector<256x128xf32>,
    } else {
    }
    %c0 = arith.constant 0 : index
    %c0_1 = arith.constant 0 : index
    %3 = vector.load %arg8[%c0, %c0_1] : memref<256x128xf32, #tpu.memory_space<vmem>>, vector<256x128xf32>
    %c0_2 = arith.constant 0 : index
    %c0_3 = arith.constant 0 : index
    %4 = vector.load %arg3[%c0_2, %c0_3] : memref<256x512xbf16, #tpu.memory_space<vmem>>, vector<256x512xbf16>
    %c0_4 = arith.constant 0 : index
    %c0_5 = arith.constant 0 : index
    %5 = vector.load %arg4[%c0_4, %c0_5] : memref<512x128xbf16, #tpu.memory_space<vmem>>, vector<512x128xbf16>
    %cst = arith.constant dense<0.000000e+00> : vector<256x128xf32>
    %6 = tpu.matmul %4, %5, %cst {dimension_numbers = #tpu.dot_dimension_numbers<[1], [0], [0], [1], [0, 0, 1, 1], [], []>} : vector<256x512xbf16>, vector<512x128xbf16>, vector<256x128xf32> -> vector<256x128xf32>
    %7 = arith.addf %3, %6 : vector<256x128xf32>
    %c0_6 = arith.constant 0 : index
    %c0_7 = arith.constant 0 : index
    %8 = vector.load %arg8[%c0_6, %c0_7] : memref<256x128xf32, #tpu.memory_space<vmem>>, vector<256x128xf32>
    tpu.vector_store %arg8[%c0_6, %c0_7], %7 {strides = array<i32>} : memref<256x128xf32, #tpu.memory_space<vmem>>, vector<256x128xf32>,
    %c0_i32_8 = arith.constant 0 : i32
    %9 = arith.cmpi eq, %arg2, %c0_i32_8 : i32
    %10 = arith.extui %9 : i1 to i32
    %c0_i32_9 = arith.constant 0 : i32
    %11 = arith.cmpi ne, %10, %c0_i32_9 : i32
    scf.if %11 {
      %c0_10 = arith.constant 0 : index
      %c0_11 = arith.constant 0 : index
      %12 = vector.load %arg8[%c0_10, %c0_11] : memref<256x128xf32, #tpu.memory_space<vmem>>, vector<256x128xf32>
      %c0_12 = arith.constant 0 : index
      %c0_13 = arith.constant 0 : index
      %13 = vector.load %arg5[%c0_12, %c0_13] : memref<1x128xf32, #tpu.memory_space<vmem>>, vector<1x128xf32>
      %14 = vector.broadcast %13 : vector<1x128xf32> to vector<256x128xf32>
      %15 = arith.mulf %12, %14 : vector<256x128xf32>
      %c0_14 = arith.constant 0 : index
      %c0_15 = arith.constant 0 : index
      %16 = vector.load %arg6[%c0_14, %c0_15] : memref<1x128xf32, #tpu.memory_space<vmem>>, vector<1x128xf32>
      %17 = vector.broadcast %16 : vector<1x128xf32> to vector<256x128xf32>
      %18 = arith.addf %15, %17 : vector<256x128xf32>
      %cst_16 = arith.constant 0.000000e+00 : f32
      %19 = vector.broadcast %cst_16 : f32 to vector<256x128xf32>
      %20 = arith.maximumf %18, %19 : vector<256x128xf32>
      %21 = arith.truncf %20 : vector<256x128xf32> to vector<256x128xbf16>
      %c0_17 = arith.constant 0 : index
      %c0_18 = arith.constant 0 : index
      %22 = vector.load %arg7[%c0_17, %c0_18] : memref<256x128xbf16, #tpu.memory_space<vmem>>, vector<256x128xbf16>
      tpu.vector_store %arg7[%c0_17, %c0_18], %21 {strides = array<i32>} : memref<256x128xbf16, #tpu.memory_space<vmem>>, vector<256x128xbf16>,
    } else {
    }
    return
  }
  func.func @transform_0(%arg0: i32, %arg1: i32, %arg2: i32) -> (i32, i32) {
    %c0_i32 = arith.constant 0 : i32
    return %arg0, %arg2 : i32, i32
  }
  func.func @transform_1(%arg0: i32, %arg1: i32, %arg2: i32) -> (i32, i32) {
    %c0_i32 = arith.constant 0 : i32
    return %arg2, %arg1 : i32, i32
  }
  func.func @transform_2(%arg0: i32, %arg1: i32, %arg2: i32) -> (i32, i32) {
    %c0_i32 = arith.constant 0 : i32
    %c0_i32_0 = arith.constant 0 : i32
    return %c0_i32, %arg1 : i32, i32
  }
  func.func @transform_3(%arg0: i32, %arg1: i32, %arg2: i32) -> (i32, i32) {
    %c0_i32 = arith.constant 0 : i32
    %c0_i32_0 = arith.constant 0 : i32
    return %c0_i32, %arg1 : i32, i32
  }
  func.func @transform_4(%arg0: i32, %arg1: i32, %arg2: i32) -> (i32, i32) {
    %c0_i32 = arith.constant 0 : i32
    return %arg0, %arg1 : i32, i32
  }
}

</mosaic_0001>

<bundles_post_ra>
// kernel: tpu_custom_call.1
= control target key start
LH: loop header
LB: loop body
LE: loop exit
PB: predicated region body
PF: predicated region fallthrough
CT: control target
= control target key end

     0   :  { %9 = vsyncpa [#allocation4], 0  ;;  %s3260_s0 = inlined_call_operand.hbm [shape: bf16[2048,512], index: 0, kind: input, shape index: {}]   ;;  %s3261_s1 = inlined_call_operand.hbm [shape: bf16[512,128], index: 1, kind: input, shape index: {}]   ;;  %s3262_s2 = inlined_call_operand.hbm [shape: f32[1,128], index: 2, kind: input, shape index: {}]   ;;  %s3263_s3 = inlined_call_operand.hbm [shape: f32[1,128], index: 3, kind: input, shape index: {}]   ;;  %s3264_s4 = inlined_call_operand.hbm [shape: bf16[2048,128], index: 4, kind: output, shape index: {}]  }
   0x1   :  { %11 = vsyncpa [#allocation4 + $0x1], 0 }
   0x2   :  { %12 = vsyncpa [#allocation7], 0 }
   0x3   :  { %13 = vsyncpa [#allocation10], 0 }
   0x4   :  { %14 = vsyncpa [#allocation5], 0 }
   0x5   :  { %16 = vsyncpa [#allocation5 + $0x1], 0  ;;  %s2827_s15 = smov 0   ;;  %s2829_s16 = smov 0  }
   0x6   :  { %s2831_s17 = smov 0   ;;  %s2833_s18 = smov 0  }
   0x7   :  { %s2835_s19 = smov 0   ;;  %s2837_s20 = smov 0  }
   0x8 LB: > { %s1852_s21 = sadd.s32 4294967295, %s2789_s20   ;;  %s1853_s22 = sadd.s32 4294967294, %s2789_s20   ;;  %s2789_s20 = sphi %s2837_s20, %s22_s20   ;;  %s2785_s19 = sphi %s2835_s19, %s3290_s19   ;;  %s2781_s18 = sphi %s2833_s18, %s3289_s18   ;;  %s2777_s17 = sphi %s2831_s17, %s3288_s17   ;;  %s2773_s16 = sphi %s2829_s16, %s3287_s16   ;;  %s2769_s15 = sphi %s2827_s15, %s3286_s15  }
   0x9   : > { %p63_p0 = scmp.ne.s32.totalorder %s2773_s16, %s2769_s15  ;;  %p2861_p1 = scmp.eq.s32.totalorder %s1852_s21, 0 }
   0xa   : > { %p2865_p2 = scmp.eq.s32.totalorder %s1852_s21, 7  ;;  %p175_p3 = scmp.eq.s32.totalorder %s1853_s22, 7 }
   0xb   : > { %s3270_s23 = scalar_select %p2861_p1, 1, 0 }
   0xc   : > { %s3271_s24 = scalar_select %p2865_p2, 1, 0 }
   0xd   : > { %p2871_p4 = por %p2861_p1, %p63_p0  ;;  %p1854_p5 = scmp.ge.s32.totalorder %s2789_s20, 1 }
   0xe   : > { %p2876_p6 = por %p175_p3, %p63_p0  ;;  %p182_p7 = scmp.lt.s32.totalorder %s2789_s20, 9 }
   0xf   : > { %s3272_s25 = scalar_select %p2871_p4, 1, 0 }
  0x10   : > { %s3273_s26 = scalar_select %p2876_p6, 1, 0 }
  0x11   : > { %p2881_p8 = pnand %p1854_p5, %p182_p7  ;;  %s2791_s28 = smov [#allocation6]  }
  0x12   : > { %3274 = sst [smem:[#allocation16_spill]] %s3273_s26  ;;  %s198_s29 = sshll.u32 %s2791_s28, 4  ;;  %s2885_s29 = int_to_ptr.vmem [resolvable:$true] %s198_s29 }
  0x13   : > { %s3275_s27 = scalar_select %p2881_p8, 1, 0 }
  0x14   : > { %p2374_p9 = pneg %p2881_p8  ;;  %s2792_s5 = smov [#allocation8]  }
  0x15   : > { %s214_s6 = sshll.u32 %s2792_s5, 4  ;;  %s2793_s7 = smov [#allocation9]   ;;  %s2895_s6 = int_to_ptr.vmem [resolvable:$true] %s214_s6 }
  0x16   : > { %p2891_p10 = pnand %p2374_p9, %p2861_p1  ;;  %s2897_s8 = sshll.u32 %s2793_s7, 4  ;;  %s228_s8 = int_to_ptr.vmem [resolvable:$true] %s2897_s8 }
  0x17   : > { %s2585_s11 = scalar_lea.hbm %s3261_s1, 4096 }
  0x18   : > { %p2586_p11 = scmp.ne.s32.totalorder %s3261_s1, %s2585_s11  ;;  %p2907_p12 = pneg %p2891_p10 }
  0x19   : > { %p2592_p3 = scmp.lt.u32.totalorder %s2585_s11, %s3261_s1 }
  0x1a   : > { %p2588_p13 = pnand %p2907_p12, %p2586_p11 }
  0x1c   : > { %p2589_p0 = pneg %p2588_p13 }
  0x1e   : > { %p2594_p5 = pnand %p2592_p3, %p2589_p0 }
  0x20   : > { %2597 = shalt.err (!%p2594_p5)
}
  0x21   : > { %s2598_s28 = scalar_lea.vmem %s2885_s29, 4096  ;;  %p2606_p1 = scmp.lt.s32.totalorder %s2885_s29, %s2885_s29 }
  0x22   : > { %p2599_p7 = scmp.ne.s32.totalorder %s2885_s29, %s2598_s28  ;;  %p2607_p4 = scmp.lt.s32.totalorder %s2598_s28, %s2598_s28 }
  0x24   : > { %p2601_p9 = pnand %p2599_p7, %p2907_p12  ;;  %p2608_p11 = por %p2607_p4, %p2606_p1 }
  0x26   : > { %p2602_p6 = pneg %p2601_p9 }
  0x28   : > { %p2609_p13 = pnand %p2608_p11, %p2602_p6 }
  0x2a   : > { %2612 = shalt.err (!%p2609_p13)
}
  0x2b   : > { %s2794_s5 = smov 64   ;;  %s2795_s7 = smov 4  }
  0x2c   : > { %2377 = dma.hbm_to_vmem [thread:$0]  (!%p2891_p10), %s3261_s1, 4096, %s2885_s29, [#allocation7], %s2794_s5, %s2794_s5, %s2795_s7  }
  0x2d   : > { %s2613_s13 = scalar_lea.hbm %s3262_s2, 16 }
  0x2e   : > { %p2614_p1 = scmp.ne.s32.totalorder %s3262_s2, %s2613_s13  ;;  %p2620_p0 = scmp.lt.u32.totalorder %s2613_s13, %s3262_s2 }
  0x30   : > { %p2616_p4 = pnand %p2614_p1, %p2907_p12 }
  0x32   : > { %p2617_p6 = pneg %p2616_p4 }
  0x34   : > { %p2622_p3 = pnand %p2620_p0, %p2617_p6 }
  0x36   : > { %2625 = shalt.err (!%p2622_p3)
}
  0x37   : > { %s2626_s29 = scalar_lea.vmem %s2895_s6, 16  ;;  %s2633_s5 = scalar_lea.vmem %s2895_s6, 32 }
  0x38   : > { %p2627_p5 = scmp.ne.s32.totalorder %s2895_s6, %s2626_s29  ;;  %p2634_p11 = scmp.lt.s32.totalorder %s2895_s6, %s2895_s6 }
  0x39   : > { %p2635_p13 = scmp.lt.s32.totalorder %s2633_s5, %s2626_s29 }
  0x3a   : > { %p2629_p7 = pnand %p2627_p5, %p2907_p12 }
  0x3b   : > { %p2636_p1 = por %p2635_p13, %p2634_p11 }
  0x3c   : > { %p2630_p9 = pneg %p2629_p7 }
  0x3e   : > { %p2637_p4 = pnand %p2636_p1, %p2630_p9 }
  0x40   : > { %2640 = shalt.err (!%p2637_p4)
}
  0x41   : > { %2380 = dma.hbm_to_vmem [thread:$0]  (!%p2891_p10), %s3262_s2, 16, %s2895_s6, [#allocation7]  }
  0x42   : > { %s2641_s11 = scalar_lea.hbm %s3263_s3, 16 }
  0x43   : > { %p2642_p6 = scmp.ne.s32.totalorder %s3263_s3, %s2641_s11  ;;  %p2648_p5 = scmp.lt.u32.totalorder %s2641_s11, %s3263_s3 }
  0x45   : > { %p2644_p0 = pnand %p2642_p6, %p2907_p12 }
  0x47   : > { %p2645_p3 = pneg %p2644_p0 }
  0x49   : > { %p2650_p7 = pnand %p2648_p5, %p2645_p3 }
  0x4b   : > { %2653 = shalt.err (!%p2650_p7)
}
  0x4c   : > { %s2654_s28 = scalar_lea.vmem %s228_s8, 16  ;;  %s2661_s6 = scalar_lea.vmem %s228_s8, 32 }
  0x4d   : > { %p2655_p9 = scmp.ne.s32.totalorder %s228_s8, %s2654_s28  ;;  %p2662_p1 = scmp.lt.s32.totalorder %s228_s8, %s228_s8 }
  0x4e   : > { %p2663_p4 = scmp.lt.s32.totalorder %s2661_s6, %s2654_s28 }
  0x4f   : > { %p2657_p11 = pnand %p2655_p9, %p2907_p12 }
  0x50   : > { %p2664_p8 = por %p2663_p4, %p2662_p1 }
  0x51   : > { %p2658_p13 = pneg %p2657_p11 }
  0x53   : > { %p2665_p2 = pnand %p2664_p8, %p2658_p13 }
  0x55   : > { %2668 = shalt.err (!%p2665_p2)
}
  0x56   : > { %2383 = dma.hbm_to_vmem [thread:$0]  (!%p2891_p10), %s3263_s3, 16, %s228_s8, [#allocation10]  }
  0x57   : > { %s50_s14 = sadd.s32 1, %s2777_s17  ;;  %s41_s26 = sadd.s32 1, %s2785_s19 }
  0x58   : > { %p57_p2 = scmp.ne.s32.totalorder %s2777_s17, %s2773_s16  ;;  %p43_p8 = scmp.ge.s32.totalorder %s41_s26, 8 }
  0x59   : > { %p58_p12 = scmp.eq.s32.totalorder %s2789_s20, 0  ;;  %p3278_p6 = scmp.ne.s32.totalorder %s3271_s24, 0 }
  0x5a   : > { %p2395_p3 = scmp.lt.s32.totalorder %s2789_s20, 8  ;;  %s3292_s26 = smov (%p43_p8, %s41_s26), 0 }
  0x5b   : > { %p2978_p0 = por %p3278_p6, %p57_p2  ;;  %p59_p5 = por %p58_p12, %p57_p2 }
  0x5c   : > { %s238_s7 = sand.u32 1, %s2777_s17   ;;  %s45_s9 = ssub.s32 %s2785_s19, %s3292_s26 }
  0x5d   : > { %p48_p7 = scmp.eq.s32.totalorder %s45_s9, 0  ;;  %s1859_s8 = sshll.u32 %s238_s7, 9 }
  0x5e   : > { %s2005_s10 = sshll.u32 %s2785_s19, 13  ;;  %s242_s21 = scalar_lea.vmem [#allocation3], %s1859_s8 }
  0x5f   : > { %s2990_s11 = scalar_select %p48_p7, %s2777_s17, %s50_s14  }
  0x60   : > { %s2995_s24 = scalar_lea.hbm %s3260_s0, %s2005_s10  ;;  %s252_s22 = sshll.u32 %s242_s21, 4  ;;  %s2997_s22 = int_to_ptr.vmem [resolvable:$true] %s252_s22 }
  0x61   : > { %p3001_p10 = pnand %p2395_p3, %p59_p5  ;;  %s3005_s6 = scalar_lea.sflag [#allocation4], %s238_s7 }
  0x62   : > { %s2669_s29 = scalar_lea.hbm %s2995_s24, 8192  ;;  %s2674_s9 = scalar_lea.hbm %s3260_s0, 65536 }
  0x63   : > { %p2670_p9 = scmp.ne.s32.totalorder %s2995_s24, %s2669_s29  ;;  %p2671_p11 = pneg %p3001_p10 }
  0x64   : > { %p2675_p4 = scmp.lt.u32.totalorder %s2995_s24, %s3260_s0  ;;  %p2676_p2 = scmp.lt.u32.totalorder %s2674_s9, %s2669_s29 }
  0x65   : > { %p2672_p13 = pnand %p2671_p11, %p2670_p9  ;;  %p2678_p12 = scmp.lt.u32.totalorder %s2669_s29, %s2995_s24 }
  0x66   : > { %p2677_p8 = por %p2676_p2, %p2675_p4 }
  0x67   : > { %p2673_p1 = pneg %p2672_p13 }
  0x68   : > { %p2679_p6 = por %p2678_p12, %p2677_p8 }
  0x6a   : > { %p2680_p3 = pnand %p2679_p6, %p2673_p1 }
  0x6c   : > { %2683 = shalt.err (!%p2680_p3)
}
  0x6d   : > { %s2684_s7 = scalar_lea.vmem %s2997_s22, 8192  ;;  %s2796_s12 = smov [#allocation3]  }
  0x6e   : > { %p2685_p5 = scmp.ne.s32.totalorder %s2997_s22, %s2684_s7  ;;  %s2689_s13 = sshll.u32 %s2796_s12, 4  ;;  %s2690_s13 = int_to_ptr.vmem [resolvable:$false] %s2689_s13 }
  0x6f   : > { %s2691_s21 = scalar_lea.vmem %s2690_s13, 16384  ;;  %p2692_p13 = scmp.lt.s32.totalorder %s2997_s22, %s2690_s13 }
  0x70   : > { %p2687_p7 = pnand %p2685_p5, %p2671_p11  ;;  %p2693_p4 = scmp.lt.s32.totalorder %s2691_s21, %s2684_s7 }
  0x72   : > { %p2688_p9 = pneg %p2687_p7  ;;  %p2694_p2 = por %p2693_p4, %p2692_p13 }
  0x74   : > { %p2695_p8 = pnand %p2694_p2, %p2688_p9 }
  0x76   : > { %2698 = shalt.err (!%p2695_p8)
}
  0x77   : > { %s2797_s29 = smov 256   ;;  %s2798_s5 = smov 16  }
  0x78   : > { %2387 = dma.hbm_to_vmem [thread:$0]  (!%p3001_p10), %s2995_s24, 8192, %s2997_s22, %s3005_s6, %s2797_s29, %s2797_s29, %s2798_s5  }
  0x79   : > { %p3281_p11 = scmp.ne.s32.totalorder %s3275_s27, 0 }
  0x7a   : > { %s3036_s14 = sand.u32 (!%p3281_p11), 1, %s2773_s16   ;;  %p3282_p1 = scmp.ne.s32.totalorder (!%p3281_p11), %s3272_s25, 0 }
  0x7b   : > { %264 = sbr.rel (%p3281_p11) target bundleno = 533 (0x215), region = 36  ;;  %s1864_s9 = sshll.u32 (!%p3281_p11), %s3036_s14, 9 }
  0x7c   : > { %s267_s8 = scalar_lea.sflag (!%p3281_p11), [#allocation4], %s3036_s14  ;;  %s3040_s10 = scalar_lea.vmem (!%p3281_p11), [#allocation3], %s1864_s9 }
  0x82   : > { %2752 = dma.done.wait (%p3282_p1), %s267_s8, 8192  }
  0x83   : > { %2754 = vsyncadd (%p3282_p1), %s267_s8, 4294959104  ;;  %p3283_p10 = scmp.ne.s32.totalorder %s3270_s23, 0 }
  0x85   : > { %2756 = dma.done.wait (%p3283_p10), [#allocation7], 4112  }
  0x86   : > { %2758 = vsyncadd (%p3283_p10), [#allocation7], 4294963184 }
  0x87   : > { %2760 = dma.done.wait (%p3283_p10), [#allocation10], 16  }
  0x88   : > { %2762 = vsyncadd (%p3283_p10), [#allocation10], 4294967280  ;;  %v2457_v0 = vld [vmem:[#allocation6 + $0x40] sm:$0xff]   ;;  %v2461_v4 = vld [vmem:[#allocation6 + $0x48] sm:$0xff]   ;;  %s1868_s23 = sshll.u32 %s3036_s14, 7  ;;  %s2038_s27 = sshll.u32 %s2781_s18, 11 }
  0x89   : > { %v2458_v1 = vld [vmem:[#allocation6 + $0xc0] sm:$0xff]   ;;  %2134 = vmatprep.subr.bf16.mxu0 %v2457_v0  ;;  %v2462_v5 = vld [vmem:[#allocation6 + $0xc8] sm:$0xff]   ;;  %v2465_v8 = vld [vmem:[#allocation6 + $0x50] sm:$0xff]   ;;  %s3128_s25 = scalar_lea.vmem [#allocation11], %s1868_s23  ;;  %s3209_s6 = scalar_lea.hbm %s3264_s4, %s2038_s27 }
  0x8a   : > { %v2459_v2 = vld [vmem:[#allocation6] sm:$0xff]   ;;  %2246 = vmatprep.subr.bf16.mxu1 %v2458_v1  ;;  %v2463_v6 = vld [vmem:[#allocation6 + $0x8] sm:$0xff]   ;;  %v2466_v9 = vld [vmem:[#allocation6 + $0xd0] sm:$0xff]   ;;  %s1726_s24 = sshll.u32 %s3128_s25, 4  ;;  %s1712_s7 = scalar_lea.sflag [#allocation5], %s3036_s14  ;;  %s3211_s24 = int_to_ptr.vmem [resolvable:$true] %s1726_s24 }
  0x8b   : > { %v2460_v3 = vld [vmem:[#allocation6 + $0x80] sm:$0xff]   ;;  %2135 = vmatpush3.bf16.msra.mxu0 %v2459_v2  ;;  %v2464_v7 = vld [vmem:[#allocation6 + $0x88] sm:$0xff]   ;;  %v2467_v10 = vld [vmem:[#allocation6 + $0x10] sm:$0xff]   ;;  %s2699_s12 = scalar_lea.vmem %s3211_s24, 2048  ;;  %s2799_s18 = smov [#allocation11]  }
  0x8c   : > { %2247 = vmatpush3.bf16.msra.mxu1 %v2460_v3  ;;  %2136 = vmatprep.subr.bf16.mxu0 %v2461_v4  ;;  %v2468_v11 = vld [vmem:[#allocation6 + $0x90] sm:$0xff]   ;;  %v2469_v12 = vld [vmem:[#allocation6 + $0x58] sm:$0xff]   ;;  %v2473_v16 = vld [vmem:[#allocation6 + $0x60] sm:$0xff]   ;;  %p2700_p12 = scmp.ne.s32.totalorder %s3211_s24, %s2699_s12  ;;  %s2703_s13 = sshll.u32 %s2799_s18, 4  ;;  %s2704_s13 = int_to_ptr.vmem [resolvable:$false] %s2703_s13 }
  0x8d   : > { %2248 = vmatprep.subr.bf16.mxu1 %v2462_v5  ;;  %v2470_v13 = vld [vmem:[#allocation6 + $0xd8] sm:$0xff]   ;;  %v2474_v17 = vld [vmem:[#allocation6 + $0xe0] sm:$0xff]   ;;  %v2477_v20 = vld [vmem:[#allocation6 + $0x68] sm:$0xff]   ;;  %s2705_s21 = scalar_lea.vmem %s2704_s13, 4096  ;;  %p2706_p5 = scmp.lt.s32.totalorder %s3211_s24, %s2704_s13 }
  0x8e   : > { %v2471_v14 = vld [vmem:[#allocation6 + $0x18] sm:$0xff]   ;;  %v2475_v18 = vld [vmem:[#allocation6 + $0x20] sm:$0xff]   ;;  %v2478_v21 = vld [vmem:[#allocation6 + $0xe8] sm:$0xff]   ;;  %p2701_p6 = pnand %p2700_p12, %p2978_p0  ;;  %p2707_p7 = scmp.lt.s32.totalorder %s2705_s21, %s2699_s12 }
  0x8f   : > { %2137 = vmatpush3.bf16.msra.mxu0 %v2463_v6  ;;  %v2472_v15 = vld [vmem:[#allocation6 + $0x98] sm:$0xff]   ;;  %v2476_v19 = vld [vmem:[#allocation6 + $0xa0] sm:$0xff]   ;;  %v2479_v22 = vld [vmem:[#allocation6 + $0x28] sm:$0xff]  }
  0x90   : > { %2249 = vmatpush3.bf16.msra.mxu1 %v2464_v7  ;;  %2138 = vmatprep.subr.bf16.mxu0 %v2465_v8  ;;  %v2480_v23 = vld [vmem:[#allocation6 + $0xa8] sm:$0xff]   ;;  %v2481_v24 = vld [vmem:[#allocation6 + $0x70] sm:$0xff]   ;;  %v2485_v28 = vld [vmem:[#allocation6 + $0x78] sm:$0xff]   ;;  %p2702_p3 = pneg %p2701_p6  ;;  %p2708_p9 = por %p2707_p7, %p2706_p5 }
  0x91   : > { %2250 = vmatprep.subr.bf16.mxu1 %v2466_v9  ;;  %v2482_v25 = vld [vmem:[#allocation6 + $0xf0] sm:$0xff]   ;;  %v2486_v29 = vld [vmem:[#allocation6 + $0xf8] sm:$0xff]  }
  0x92   : > { %v2483_v26 = vld [vmem:[#allocation6 + $0x30] sm:$0xff]   ;;  %v2487_v30 = vld [vmem:[#allocation6 + $0x38] sm:$0xff]   ;;  %p2709_p13 = pnand %p2708_p9, %p2702_p3 }
  0x93   : > { %2139 = vmatpush3.bf16.msra.mxu0 %v2467_v10  ;;  %v2484_v27 = vld [vmem:[#allocation6 + $0xb0] sm:$0xff]   ;;  %v2488_v31 = vld [vmem:[#allocation6 + $0xb8] sm:$0xff]  }
  0x94   : > { %2251 = vmatpush3.bf16.msra.mxu1 %v2468_v11  ;;  %2140 = vmatprep.subr.bf16.mxu0 %v2469_v12  ;;  %v2489_v32 = vld [vmem:[%s3040_s10] ss:$16 sps:$4 sm:$0xff]   ;;  %v2491_v33 = vld [vmem:[%s3040_s10 + $0x4] ss:$16 sps:$4 sm:$0xff]   ;;  %v2492_v34 = vld [vmem:[%s3040_s10 + $0x8] ss:$16 sps:$4 sm:$0xff]  }
  0x95   : > { %2252 = vmatprep.subr.bf16.mxu1 %v2470_v13  ;;  %v2494_v35 = vld [vmem:[%s3040_s10 + $0xc] ss:$16 sps:$4 sm:$0xff]   ;;  %1052 = vmatprep.mubr.bf16.mxu0 %v2491_v33  ;;  %v2495_v36 = vld [vmem:[%s3040_s10 + $0x24] ss:$16 sps:$4 sm:$0xff]   ;;  %v2499_v38 = vld [vmem:[%s3040_s10 + $0x20] ss:$16 sps:$4 sm:$0xff]  }
  0x96   : > { %1213 = vmatprep.mubr.bf16.mxu1 %v2494_v35  ;;  %v2497_v37 = vld [vmem:[%s3040_s10 + $0x2c] ss:$16 sps:$4 sm:$0xff]   ;;  %v2500_v39 = vld [vmem:[%s3040_s10 + $0x28] ss:$16 sps:$4 sm:$0xff]   ;;  %v2501_v40 = vld [vmem:[%s3040_s10 + $0x44] ss:$16 sps:$4 sm:$0xff]  }
  0x97   : > { %2141 = vmatpush3.bf16.msra.mxu0 %v2471_v14  ;;  %v2503_v41 = vld [vmem:[%s3040_s10 + $0x4c] ss:$16 sps:$4 sm:$0xff]   ;;  %v2505_v42 = vld [vmem:[%s3040_s10 + $0x40] ss:$16 sps:$4 sm:$0xff]   ;;  %v2506_v43 = vld [vmem:[%s3040_s10 + $0x48] ss:$16 sps:$4 sm:$0xff]  }
  0x98   : > { %2253 = vmatpush3.bf16.msra.mxu1 %v2472_v15  ;;  %2142 = vmatprep.subr.bf16.mxu0 %v2473_v16  ;;  %v2507_v44 = vld [vmem:[%s3040_s10 + $0x64] ss:$16 sps:$4 sm:$0xff]   ;;  %v2509_v45 = vld [vmem:[%s3040_s10 + $0x6c] ss:$16 sps:$4 sm:$0xff]   ;;  %v2511_v46 = vld [vmem:[%s3040_s10 + $0x60] ss:$16 sps:$4 sm:$0xff]  }
  0x99   : > { %2254 = vmatprep.subr.bf16.mxu1 %v2474_v17  ;;  %v2512_v47 = vld [vmem:[%s3040_s10 + $0x68] ss:$16 sps:$4 sm:$0xff]   ;;  %v2513_v48 = vld [vmem:[%s3040_s10 + $0x84] ss:$16 sps:$4 sm:$0xff]   ;;  %v2515_v49 = vld [vmem:[%s3040_s10 + $0x8c] ss:$16 sps:$4 sm:$0xff]  }
  0x9a   : > { %v2517_v50 = vld [vmem:[%s3040_s10 + $0x80] ss:$16 sps:$4 sm:$0xff]   ;;  %v2518_v51 = vld [vmem:[%s3040_s10 + $0x88] ss:$16 sps:$4 sm:$0xff]   ;;  %v2519_v52 = vld [vmem:[%s3040_s10 + $0xa4] ss:$16 sps:$4 sm:$0xff]  }
  0x9b   : > { %2143 = vmatpush3.bf16.msra.mxu0 %v2475_v18  ;;  %v2521_v53 = vld [vmem:[%s3040_s10 + $0xac] ss:$16 sps:$4 sm:$0xff]   ;;  %v2523_v54 = vld [vmem:[%s3040_s10 + $0xa0] ss:$16 sps:$4 sm:$0xff]   ;;  %v2524_v55 = vld [vmem:[%s3040_s10 + $0xa8] ss:$16 sps:$4 sm:$0xff]  }
  0x9c   : > { %2255 = vmatpush3.bf16.msra.mxu1 %v2476_v19  ;;  %2144 = vmatprep.subr.bf16.mxu0 %v2477_v20  ;;  %v2525_v56 = vld [vmem:[%s3040_s10 + $0xc4] ss:$16 sps:$4 sm:$0xff]   ;;  %v2527_v57 = vld [vmem:[%s3040_s10 + $0xcc] ss:$16 sps:$4 sm:$0xff]   ;;  %v2529_v58 = vld [vmem:[%s3040_s10 + $0xc0] ss:$16 sps:$4 sm:$0xff]  }
  0x9d   : > { %2256 = vmatprep.subr.bf16.mxu1 %v2478_v21  ;;  %v2530_v59 = vld [vmem:[%s3040_s10 + $0xc8] ss:$16 sps:$4 sm:$0xff]   ;;  %v2531_v60 = vld [vmem:[%s3040_s10 + $0xe4] ss:$16 sps:$4 sm:$0xff]   ;;  %v2533_v61 = vld [vmem:[%s3040_s10 + $0xec] ss:$16 sps:$4 sm:$0xff]  }
  0x9e   : > { %v2535_v62 = vld [vmem:[%s3040_s10 + $0xe0] ss:$16 sps:$4 sm:$0xff]   ;;  %v2536_v63 = vld [vmem:[%s3040_s10 + $0xe8] ss:$16 sps:$4 sm:$0xff]   ;;  %v2537_v0 = vld [vmem:[%s3040_s10 + $0x104] ss:$16 sps:$4 sm:$0xff]  }
  0x9f   : > { %2145 = vmatpush3.bf16.msra.mxu0 %v2479_v22  ;;  %v2539_v1 = vld [vmem:[%s3040_s10 + $0x10c] ss:$16 sps:$4 sm:$0xff]   ;;  %v2541_v2 = vld [vmem:[%s3040_s10 + $0x100] ss:$16 sps:$4 sm:$0xff]   ;;  %v2542_v3 = vld [vmem:[%s3040_s10 + $0x108] ss:$16 sps:$4 sm:$0xff]  }
  0xa0   : > { %2257 = vmatpush3.bf16.msra.mxu1 %v2480_v23  ;;  %2146 = vmatprep.subr.bf16.mxu0 %v2481_v24  ;;  %v2543_v4 = vld [vmem:[%s3040_s10 + $0x124] ss:$16 sps:$4 sm:$0xff]   ;;  %v2545_v5 = vld [vmem:[%s3040_s10 + $0x12c] ss:$16 sps:$4 sm:$0xff]   ;;  %v2547_v6 = vld [vmem:[%s3040_s10 + $0x120] ss:$16 sps:$4 sm:$0xff]  }
  0xa1   : > { %2258 = vmatprep.subr.bf16.mxu1 %v2482_v25  ;;  %v2548_v7 = vld [vmem:[%s3040_s10 + $0x128] ss:$16 sps:$4 sm:$0xff]   ;;  %v2549_v8 = vld [vmem:[%s3040_s10 + $0x144] ss:$16 sps:$4 sm:$0xff]   ;;  %v2551_v9 = vld [vmem:[%s3040_s10 + $0x14c] ss:$16 sps:$4 sm:$0xff]  }
  0xa2   : > { %v2553_v10 = vld [vmem:[%s3040_s10 + $0x140] ss:$16 sps:$4 sm:$0xff]   ;;  %v2554_v11 = vld [vmem:[%s3040_s10 + $0x148] ss:$16 sps:$4 sm:$0xff]   ;;  %v2555_v12 = vld [vmem:[%s3040_s10 + $0x164] ss:$16 sps:$4 sm:$0xff]  }
  0xa3   : > { %2147 = vmatpush3.bf16.msra.mxu0 %v2483_v26  ;;  %v2557_v13 = vld [vmem:[%s3040_s10 + $0x16c] ss:$16 sps:$4 sm:$0xff]   ;;  %v2559_v14 = vld [vmem:[%s3040_s10 + $0x160] ss:$16 sps:$4 sm:$0xff]   ;;  %v2560_v15 = vld [vmem:[%s3040_s10 + $0x168] ss:$16 sps:$4 sm:$0xff]  }
  0xa4   : > { %2259 = vmatpush3.bf16.msra.mxu1 %v2484_v27  ;;  %2148 = vmatprep.subr.bf16.mxu0 %v2485_v28  ;;  %v2561_v16 = vld [vmem:[%s3040_s10 + $0x184] ss:$16 sps:$4 sm:$0xff]   ;;  %v2563_v17 = vld [vmem:[%s3040_s10 + $0x18c] ss:$16 sps:$4 sm:$0xff]   ;;  %v2565_v18 = vld [vmem:[%s3040_s10 + $0x180] ss:$16 sps:$4 sm:$0xff]  }
  0xa5   : > { %2260 = vmatprep.subr.bf16.mxu1 %v2486_v29  ;;  %v2566_v19 = vld [vmem:[%s3040_s10 + $0x188] ss:$16 sps:$4 sm:$0xff]   ;;  %v2567_v20 = vld [vmem:[%s3040_s10 + $0x1a4] ss:$16 sps:$4 sm:$0xff]   ;;  %v2569_v21 = vld [vmem:[%s3040_s10 + $0x1ac] ss:$16 sps:$4 sm:$0xff]  }
  0xa6   : > { %v2571_v22 = vld [vmem:[%s3040_s10 + $0x1a0] ss:$16 sps:$4 sm:$0xff]   ;;  %v2572_v23 = vld [vmem:[%s3040_s10 + $0x1a8] ss:$16 sps:$4 sm:$0xff]   ;;  %v2573_v24 = vld [vmem:[%s3040_s10 + $0x1c4] ss:$16 sps:$4 sm:$0xff]  }
  0xa7   : > { %2149 = vmatpush3.bf16.msra.mxu0 %v2487_v30  ;;  %v2575_v25 = vld [vmem:[%s3040_s10 + $0x1cc] ss:$16 sps:$4 sm:$0xff]   ;;  %v2577_v26 = vld [vmem:[%s3040_s10 + $0x1c0] ss:$16 sps:$4 sm:$0xff]   ;;  %v2578_v27 = vld [vmem:[%s3040_s10 + $0x1c8] ss:$16 sps:$4 sm:$0xff]  }
  0xa8   : > { %2261 = vmatpush3.bf16.msra.mxu1 %v2488_v31  ;;  %v2579_v28 = vld [vmem:[%s3040_s10 + $0x1e4] ss:$16 sps:$4 sm:$0xff]   ;;  %v2581_v29 = vld [vmem:[%s3040_s10 + $0x1ec] ss:$16 sps:$4 sm:$0xff]   ;;  %v2583_v30 = vld [vmem:[%s3040_s10 + $0x1e0] ss:$16 sps:$4 sm:$0xff]  }
  0xa9   : > { %v2584_v31 = vld [vmem:[%s3040_s10 + $0x1e8] ss:$16 sps:$4 sm:$0xff]  }
  0xaa   : > { %1053 = vmatmul.mubr.bf16.vlgmr.msra.gmra.mrb[0].mxu0 %v2489_v32 }
  0xab   : > { %1214 = vmatmul.mubr.bf16.vlgmr.msra.gmra.mrb[0].mxu1 %v2492_v34  ;;  %1060 = vmatprep.mubr.bf16.mxu0 %v2495_v36 }
  0xac   : > { %1221 = vmatprep.mubr.bf16.mxu1 %v2497_v37 }
  0xb2   : > { %1061 = vmatmul.mubr.bf16.gmra.mrb[4].mxu0 %v2499_v38 }
  0xb3   : > { %1222 = vmatmul.mubr.bf16.gmra.mrb[4].mxu1 %v2500_v39  ;;  %1068 = vmatprep.mubr.bf16.mxu0 %v2501_v40 }
  0xb4   : > { %1229 = vmatprep.mubr.bf16.mxu1 %v2503_v41  ;;  %v3118_v41 = vld [vmem:[#allocation8] ss:$0 sm:$0xff] }
  0xba   : > { %1069 = vmatmul.mubr.bf16.gmra.mrb[8].mxu0 %v2505_v42 }
  0xbb   : > { %1230 = vmatmul.mubr.bf16.gmra.mrb[8].mxu1 %v2506_v43  ;;  %1076 = vmatprep.mubr.bf16.mxu0 %v2507_v44 }
  0xbc   : > { %1237 = vmatprep.mubr.bf16.mxu1 %v2509_v45 }
  0xc2   : > { %1077 = vmatmul.mubr.bf16.gmra.mrb[12].mxu0 %v2511_v46  ;;  %v3120_v46 = vld [vmem:[#allocation9] ss:$0 sm:$0xff] }
  0xc3   : > { %1238 = vmatmul.mubr.bf16.gmra.mrb[12].mxu1 %v2512_v47  ;;  %1084 = vmatprep.mubr.bf16.mxu0 %v2513_v48 }
  0xc4   : > { %1245 = vmatprep.mubr.bf16.mxu1 %v2515_v49 }
  0xca   : > { %1085 = vmatmul.mubr.bf16.gmra.mrb[16].mxu0 %v2517_v50 }
  0xcb   : > { %1246 = vmatmul.mubr.bf16.gmra.mrb[16].mxu1 %v2518_v51  ;;  %1092 = vmatprep.mubr.bf16.mxu0 %v2519_v52 }
  0xcc   : > { %1253 = vmatprep.mubr.bf16.mxu1 %v2521_v53 }
  0xd2   : > { %1093 = vmatmul.mubr.bf16.gmra.mrb[20].mxu0 %v2523_v54 }
  0xd3   : > { %1254 = vmatmul.mubr.bf16.gmra.mrb[20].mxu1 %v2524_v55  ;;  %1100 = vmatprep.mubr.bf16.mxu0 %v2525_v56 }
  0xd4   : > { %1261 = vmatprep.mubr.bf16.mxu1 %v2527_v57 }
  0xda   : > { %1101 = vmatmul.mubr.bf16.gmra.mrb[24].mxu0 %v2529_v58 }
  0xdb   : > { %1262 = vmatmul.mubr.bf16.gmra.mrb[24].mxu1 %v2530_v59  ;;  %1108 = vmatprep.mubr.bf16.mxu0 %v2531_v60 }
  0xdc   : > { %1269 = vmatprep.mubr.bf16.mxu1 %v2533_v61 }
  0xe2   : > { %1109 = vmatmul.mubr.bf16.gmra.mrb[28].mxu0 %v2535_v62 }
  0xe3   : > { %1270 = vmatmul.mubr.bf16.gmra.mrb[28].mxu1 %v2536_v63  ;;  %1116 = vmatprep.mubr.bf16.mxu0 %v2537_v0 }
  0xe4   : > { %1277 = vmatprep.mubr.bf16.mxu1 %v2539_v1 }
  0xea   : > { %1117 = vmatmul.mubr.bf16.gmra.mrb[32].mxu0 %v2541_v2 }
  0xeb   : > { %1278 = vmatmul.mubr.bf16.gmra.mrb[32].mxu1 %v2542_v3  ;;  %1124 = vmatprep.mubr.bf16.mxu0 %v2543_v4 }
  0xec   : > { %1285 = vmatprep.mubr.bf16.mxu1 %v2545_v5 }
  0xf2   : > { %1125 = vmatmul.mubr.bf16.gmra.mrb[36].mxu0 %v2547_v6 }
  0xf3   : > { %1286 = vmatmul.mubr.bf16.gmra.mrb[36].mxu1 %v2548_v7  ;;  %1132 = vmatprep.mubr.bf16.mxu0 %v2549_v8 }
  0xf4   : > { %1293 = vmatprep.mubr.bf16.mxu1 %v2551_v9 }
  0xfa   : > { %1133 = vmatmul.mubr.bf16.gmra.mrb[40].mxu0 %v2553_v10 }
  0xfb   : > { %1294 = vmatmul.mubr.bf16.gmra.mrb[40].mxu1 %v2554_v11  ;;  %1140 = vmatprep.mubr.bf16.mxu0 %v2555_v12 }
  0xfc   : > { %1301 = vmatprep.mubr.bf16.mxu1 %v2557_v13 }
 0x102   : > { %1141 = vmatmul.mubr.bf16.gmra.mrb[44].mxu0 %v2559_v14 }
 0x103   : > { %1302 = vmatmul.mubr.bf16.gmra.mrb[44].mxu1 %v2560_v15  ;;  %1148 = vmatprep.mubr.bf16.mxu0 %v2561_v16 }
 0x104   : > { %1309 = vmatprep.mubr.bf16.mxu1 %v2563_v17 }
 0x10a   : > { %1149 = vmatmul.mubr.bf16.gmra.mrb[48].mxu0 %v2565_v18 }
 0x10b   : > { %1310 = vmatmul.mubr.bf16.gmra.mrb[48].mxu1 %v2566_v19  ;;  %1156 = vmatprep.mubr.bf16.mxu0 %v2567_v20 }
 0x10c   : > { %1317 = vmatprep.mubr.bf16.mxu1 %v2569_v21 }
 0x112   : > { %1157 = vmatmul.mubr.bf16.gmra.mrb[52].mxu0 %v2571_v22 }
 0x113   : > { %1318 = vmatmul.mubr.bf16.gmra.mrb[52].mxu1 %v2572_v23  ;;  %1164 = vmatprep.mubr.bf16.mxu0 %v2573_v24 }
 0x114   : > { %1325 = vmatprep.mubr.bf16.mxu1 %v2575_v25 }
 0x11a   : > { %1165 = vmatmul.mubr.bf16.gmra.mrb[56].mxu0 %v2577_v26 }
 0x11b   : > { %1326 = vmatmul.mubr.bf16.gmra.mrb[56].mxu1 %v2578_v27  ;;  %1172 = vmatprep.mubr.bf16.mxu0 %v2579_v28 }
 0x11c   : > { %1333 = vmatprep.mubr.bf16.mxu1 %v2581_v29 }
 0x122   : > { %1173 = vmatmul.mubr.bf16.gmra.mrb[60].mxu0 %v2583_v30 }
 0x123   : > { %1334 = vmatmul.mubr.bf16.gmra.mrb[60].mxu1 %v2584_v31 }
 0x17d   : > { %v2150_v32 = vpop.f32.mrb[0].mxu0 }
 0x17e   : > { %v2262_v33 = vpop.f32.mrb[0].mxu1  ;;  %v2151_v34 = vpop.f32.mrb[1].mxu0 }
 0x17f   : > { %v2152_v35 = vadd.f32 %v2151_v34, %v2150_v32  ;;  %v2263_v36 = vpop.f32.mrb[1].mxu1  ;;  %v2153_v37 = vpop.f32.mrb[2].mxu0 }
 0x180   : > { %v2264_v38 = vadd.f32 %v2263_v36, %v2262_v33  ;;  %v2265_v39 = vpop.f32.mrb[2].mxu1  ;;  %v2154_v40 = vpop.f32.mrb[3].mxu0 }
 0x181   : > { %v2155_v42 = vadd.f32 %v2154_v40, %v2153_v37  ;;  %v2266_v43 = vpop.f32.mrb[3].mxu1 }
 0x182   : > { %v1216_v44 = vadd.f32 %v2264_v38, %v2152_v35  ;;  %v2267_v45 = vadd.f32 %v2266_v43, %v2265_v39 }
 0x184   : > { %v1448_v47 = vmul.f32 %v3118_v41, %v1216_v44  ;;  %v1219_v48 = vadd.f32 %v2267_v45, %v2155_v42 }
 0x185   : > { %v2156_v49 = vpop.f32.mrb[4].mxu0 }
 0x186   : > { %v1487_v50 = vadd.f32 %v3120_v46, %v1448_v47  ;;  %v1449_v51 = vmul.f32 %v3118_v41, %v1219_v48  ;;  %v2268_v52 = vpop.f32.mrb[4].mxu1  ;;  %v2157_v53 = vpop.f32.mrb[5].mxu0 }
 0x187   : > { %v2158_v54 = vadd.f32 %v2157_v53, %v2156_v49  ;;  %v2269_v55 = vpop.f32.mrb[5].mxu1  ;;  %v2159_v56 = vpop.f32.mrb[6].mxu0 }
 0x188   : > { %v1488_v57 = vadd.f32 %v3120_v46, %v1449_v51  ;;  %v2270_v58 = vadd.f32 %v2269_v55, %v2268_v52  ;;  %v2271_v59 = vpop.f32.mrb[6].mxu1  ;;  %v2160_v60 = vpop.f32.mrb[7].mxu0  ;;  %v1519_v63 = vmax.f32 %v1487_v50, 0.0 }
 0x189   : > { %v2161_v61 = vadd.f32 %v2160_v60, %v2159_v56  ;;  %v2272_v62 = vpop.f32.mrb[7].mxu1 }
 0x18a   : > { %v1520_v0 = vmax.f32 %v1488_v57, 0.0  ;;  %v1224_v1 = vadd.f32 %v2270_v58, %v2158_v54  ;;  %v2273_v2 = vadd.f32 %v2272_v62, %v2271_v59 }
 0x18c   : > { %v2042_v3 = vpack.c.bf16 %v1520_v0, %v1519_v63  ;;  %v1450_v4 = vmul.f32 %v3118_v41, %v1224_v1  ;;  %v1227_v5 = vadd.f32 %v2273_v2, %v2161_v61 }
 0x18d   : > { %v2162_v6 = vpop.f32.mrb[8].mxu0 }
 0x18e   : > { %2043 = vst [vmem:[%s3128_s25] sm:$0xff] %v2042_v3   ;;  %v1489_v7 = vadd.f32 %v3120_v46, %v1450_v4  ;;  %v1451_v8 = vmul.f32 %v3118_v41, %v1227_v5  ;;  %v2274_v9 = vpop.f32.mrb[8].mxu1  ;;  %v2163_v10 = vpop.f32.mrb[9].mxu0 }
 0x18f   : > { %v2164_v11 = vadd.f32 %v2163_v10, %v2162_v6  ;;  %v2275_v12 = vpop.f32.mrb[9].mxu1  ;;  %v2165_v13 = vpop.f32.mrb[10].mxu0 }
 0x190   : > { %v1490_v14 = vadd.f32 %v3120_v46, %v1451_v8  ;;  %v2276_v15 = vadd.f32 %v2275_v12, %v2274_v9  ;;  %v2277_v16 = vpop.f32.mrb[10].mxu1  ;;  %v2166_v17 = vpop.f32.mrb[11].mxu0  ;;  %v1521_v20 = vmax.f32 %v1489_v7, 0.0 }
 0x191   : > { %v2167_v18 = vadd.f32 %v2166_v17, %v2165_v13  ;;  %v2278_v19 = vpop.f32.mrb[11].mxu1 }
 0x192   : > { %v1522_v21 = vmax.f32 %v1490_v14, 0.0  ;;  %v1232_v22 = vadd.f32 %v2276_v15, %v2164_v11  ;;  %v2279_v23 = vadd.f32 %v2278_v19, %v2277_v16 }
 0x194   : > { %v2047_v24 = vpack.c.bf16 %v1522_v21, %v1521_v20  ;;  %v1452_v25 = vmul.f32 %v3118_v41, %v1232_v22  ;;  %v1235_v26 = vadd.f32 %v2279_v23, %v2167_v18 }
 0x195   : > { %v2168_v27 = vpop.f32.mrb[12].mxu0 }
 0x196   : > { %2119 = vst [vmem:[%s3128_s25 + $0x8] sm:$0xff] %v2047_v24   ;;  %v1491_v28 = vadd.f32 %v3120_v46, %v1452_v25  ;;  %v1453_v29 = vmul.f32 %v3118_v41, %v1235_v26  ;;  %v2280_v30 = vpop.f32.mrb[12].mxu1  ;;  %v2169_v31 = vpop.f32.mrb[13].mxu0 }
 0x197   : > { %v2170_v32 = vadd.f32 %v2169_v31, %v2168_v27  ;;  %v2281_v33 = vpop.f32.mrb[13].mxu1  ;;  %v2171_v34 = vpop.f32.mrb[14].mxu0 }
 0x198   : > { %v1492_v35 = vadd.f32 %v3120_v46, %v1453_v29  ;;  %v2282_v36 = vadd.f32 %v2281_v33, %v2280_v30  ;;  %v2283_v37 = vpop.f32.mrb[14].mxu1  ;;  %v2172_v38 = vpop.f32.mrb[15].mxu0  ;;  %v1523_v42 = vmax.f32 %v1491_v28, 0.0 }
 0x199   : > { %v2173_v39 = vadd.f32 %v2172_v38, %v2171_v34  ;;  %v2284_v40 = vpop.f32.mrb[15].mxu1 }
 0x19a   : > { %v1524_v43 = vmax.f32 %v1492_v35, 0.0  ;;  %v1240_v44 = vadd.f32 %v2282_v36, %v2170_v32  ;;  %v2285_v45 = vadd.f32 %v2284_v40, %v2283_v37 }
 0x19c   : > { %v2052_v47 = vpack.c.bf16 %v1524_v43, %v1523_v42  ;;  %v1454_v48 = vmul.f32 %v3118_v41, %v1240_v44  ;;  %v1243_v49 = vadd.f32 %v2285_v45, %v2173_v39 }
 0x19d   : > { %v2174_v50 = vpop.f32.mrb[16].mxu0 }
 0x19e   : > { %2120 = vst [vmem:[%s3128_s25 + $0x10] sm:$0xff] %v2052_v47   ;;  %v1493_v51 = vadd.f32 %v3120_v46, %v1454_v48  ;;  %v1455_v52 = vmul.f32 %v3118_v41, %v1243_v49  ;;  %v2286_v53 = vpop.f32.mrb[16].mxu1  ;;  %v2175_v54 = vpop.f32.mrb[17].mxu0 }
 0x19f   : > { %v2176_v55 = vadd.f32 %v2175_v54, %v2174_v50  ;;  %v2287_v56 = vpop.f32.mrb[17].mxu1  ;;  %v2177_v57 = vpop.f32.mrb[18].mxu0 }
 0x1a0   : > { %v1494_v58 = vadd.f32 %v3120_v46, %v1455_v52  ;;  %v2288_v59 = vadd.f32 %v2287_v56, %v2286_v53  ;;  %v2289_v60 = vpop.f32.mrb[18].mxu1  ;;  %v2178_v61 = vpop.f32.mrb[19].mxu0  ;;  %v1525_v0 = vmax.f32 %v1493_v51, 0.0 }
 0x1a1   : > { %v2179_v62 = vadd.f32 %v2178_v61, %v2177_v57  ;;  %v2290_v63 = vpop.f32.mrb[19].mxu1 }
 0x1a2   : > { %v1526_v1 = vmax.f32 %v1494_v58, 0.0  ;;  %v1248_v2 = vadd.f32 %v2288_v59, %v2176_v55  ;;  %v2291_v3 = vadd.f32 %v2290_v63, %v2289_v60 }
 0x1a4   : > { %v2057_v4 = vpack.c.bf16 %v1526_v1, %v1525_v0  ;;  %v1456_v5 = vmul.f32 %v3118_v41, %v1248_v2  ;;  %v1251_v6 = vadd.f32 %v2291_v3, %v2179_v62 }
 0x1a5   : > { %v2180_v7 = vpop.f32.mrb[20].mxu0 }
 0x1a6   : > { %2121 = vst [vmem:[%s3128_s25 + $0x18] sm:$0xff] %v2057_v4   ;;  %v1495_v8 = vadd.f32 %v3120_v46, %v1456_v5  ;;  %v1457_v9 = vmul.f32 %v3118_v41, %v1251_v6  ;;  %v2292_v10 = vpop.f32.mrb[20].mxu1  ;;  %v2181_v11 = vpop.f32.mrb[21].mxu0 }
 0x1a7   : > { %v2182_v12 = vadd.f32 %v2181_v11, %v2180_v7  ;;  %v2293_v13 = vpop.f32.mrb[21].mxu1  ;;  %v2183_v14 = vpop.f32.mrb[22].mxu0 }
 0x1a8   : > { %v1496_v15 = vadd.f32 %v3120_v46, %v1457_v9  ;;  %v2294_v16 = vadd.f32 %v2293_v13, %v2292_v10  ;;  %v2295_v17 = vpop.f32.mrb[22].mxu1  ;;  %v2184_v18 = vpop.f32.mrb[23].mxu0  ;;  %v1527_v21 = vmax.f32 %v1495_v8, 0.0 }
 0x1a9   : > { %v2185_v19 = vadd.f32 %v2184_v18, %v2183_v14  ;;  %v2296_v20 = vpop.f32.mrb[23].mxu1 }
 0x1aa   : > { %v1528_v22 = vmax.f32 %v1496_v15, 0.0  ;;  %v1256_v23 = vadd.f32 %v2294_v16, %v2182_v12  ;;  %v2297_v24 = vadd.f32 %v2296_v20, %v2295_v17 }
 0x1ac   : > { %v2062_v25 = vpack.c.bf16 %v1528_v22, %v1527_v21  ;;  %v1458_v26 = vmul.f32 %v3118_v41, %v1256_v23  ;;  %v1259_v27 = vadd.f32 %v2297_v24, %v2185_v19 }
 0x1ad   : > { %v2186_v28 = vpop.f32.mrb[24].mxu0 }
 0x1ae   : > { %2122 = vst [vmem:[%s3128_s25 + $0x20] sm:$0xff] %v2062_v25   ;;  %v1497_v29 = vadd.f32 %v3120_v46, %v1458_v26  ;;  %v1459_v30 = vmul.f32 %v3118_v41, %v1259_v27  ;;  %v2298_v31 = vpop.f32.mrb[24].mxu1  ;;  %v2187_v32 = vpop.f32.mrb[25].mxu0 }
 0x1af   : > { %v2188_v33 = vadd.f32 %v2187_v32, %v2186_v28  ;;  %v2299_v34 = vpop.f32.mrb[25].mxu1  ;;  %v2189_v35 = vpop.f32.mrb[26].mxu0 }
 0x1b0   : > { %v1498_v36 = vadd.f32 %v3120_v46, %v1459_v30  ;;  %v2300_v37 = vadd.f32 %v2299_v34, %v2298_v31  ;;  %v2301_v38 = vpop.f32.mrb[26].mxu1  ;;  %v2190_v39 = vpop.f32.mrb[27].mxu0  ;;  %v1529_v43 = vmax.f32 %v1497_v29, 0.0 }
 0x1b1   : > { %v2191_v40 = vadd.f32 %v2190_v39, %v2189_v35  ;;  %v2302_v42 = vpop.f32.mrb[27].mxu1 }
 0x1b2   : > { %v1530_v44 = vmax.f32 %v1498_v36, 0.0  ;;  %v1264_v45 = vadd.f32 %v2300_v37, %v2188_v33  ;;  %v2303_v47 = vadd.f32 %v2302_v42, %v2301_v38 }
 0x1b4   : > { %v2067_v48 = vpack.c.bf16 %v1530_v44, %v1529_v43  ;;  %v1460_v49 = vmul.f32 %v3118_v41, %v1264_v45  ;;  %v1267_v50 = vadd.f32 %v2303_v47, %v2191_v40 }
 0x1b5   : > { %v2192_v51 = vpop.f32.mrb[28].mxu0 }
 0x1b6   : > { %2123 = vst [vmem:[%s3128_s25 + $0x28] sm:$0xff] %v2067_v48   ;;  %v1499_v52 = vadd.f32 %v3120_v46, %v1460_v49  ;;  %v1461_v53 = vmul.f32 %v3118_v41, %v1267_v50  ;;  %v2304_v54 = vpop.f32.mrb[28].mxu1  ;;  %v2193_v55 = vpop.f32.mrb[29].mxu0 }
 0x1b7   : > { %v2194_v56 = vadd.f32 %v2193_v55, %v2192_v51  ;;  %v2305_v57 = vpop.f32.mrb[29].mxu1  ;;  %v2195_v58 = vpop.f32.mrb[30].mxu0 }
 0x1b8   : > { %v1500_v59 = vadd.f32 %v3120_v46, %v1461_v53  ;;  %v2306_v60 = vadd.f32 %v2305_v57, %v2304_v54  ;;  %v2307_v61 = vpop.f32.mrb[30].mxu1  ;;  %v2196_v62 = vpop.f32.mrb[31].mxu0  ;;  %v1531_v1 = vmax.f32 %v1499_v52, 0.0 }
 0x1b9   : > { %v2197_v63 = vadd.f32 %v2196_v62, %v2195_v58  ;;  %v2308_v0 = vpop.f32.mrb[31].mxu1 }
 0x1ba   : > { %v1532_v2 = vmax.f32 %v1500_v59, 0.0  ;;  %v1272_v3 = vadd.f32 %v2306_v60, %v2194_v56  ;;  %v2309_v4 = vadd.f32 %v2308_v0, %v2307_v61 }
 0x1bc   : > { %v2072_v5 = vpack.c.bf16 %v1532_v2, %v1531_v1  ;;  %v1462_v6 = vmul.f32 %v3118_v41, %v1272_v3  ;;  %v1275_v7 = vadd.f32 %v2309_v4, %v2197_v63 }
 0x1bd   : > { %v2198_v8 = vpop.f32.mrb[32].mxu0 }
 0x1be   : > { %2124 = vst [vmem:[%s3128_s25 + $0x30] sm:$0xff] %v2072_v5   ;;  %v1501_v9 = vadd.f32 %v3120_v46, %v1462_v6  ;;  %v1463_v10 = vmul.f32 %v3118_v41, %v1275_v7  ;;  %v2310_v11 = vpop.f32.mrb[32].mxu1  ;;  %v2199_v12 = vpop.f32.mrb[33].mxu0 }
 0x1bf   : > { %v2200_v13 = vadd.f32 %v2199_v12, %v2198_v8  ;;  %v2311_v14 = vpop.f32.mrb[33].mxu1  ;;  %v2201_v15 = vpop.f32.mrb[34].mxu0 }
 0x1c0   : > { %v1502_v16 = vadd.f32 %v3120_v46, %v1463_v10  ;;  %v2312_v17 = vadd.f32 %v2311_v14, %v2310_v11  ;;  %v2313_v18 = vpop.f32.mrb[34].mxu1  ;;  %v2202_v19 = vpop.f32.mrb[35].mxu0  ;;  %v1533_v22 = vmax.f32 %v1501_v9, 0.0 }
 0x1c1   : > { %v2203_v20 = vadd.f32 %v2202_v19, %v2201_v15  ;;  %v2314_v21 = vpop.f32.mrb[35].mxu1 }
 0x1c2   : > { %v1534_v23 = vmax.f32 %v1502_v16, 0.0  ;;  %v1280_v24 = vadd.f32 %v2312_v17, %v2200_v13  ;;  %v2315_v25 = vadd.f32 %v2314_v21, %v2313_v18 }
 0x1c4   : > { %v2077_v26 = vpack.c.bf16 %v1534_v23, %v1533_v22  ;;  %v1464_v27 = vmul.f32 %v3118_v41, %v1280_v24  ;;  %v1283_v28 = vadd.f32 %v2315_v25, %v2203_v20 }
 0x1c5   : > { %v2204_v29 = vpop.f32.mrb[36].mxu0 }
 0x1c6   : > { %2125 = vst [vmem:[%s3128_s25 + $0x38] sm:$0xff] %v2077_v26   ;;  %v1503_v30 = vadd.f32 %v3120_v46, %v1464_v27  ;;  %v1465_v31 = vmul.f32 %v3118_v41, %v1283_v28  ;;  %v2316_v32 = vpop.f32.mrb[36].mxu1  ;;  %v2205_v33 = vpop.f32.mrb[37].mxu0 }
 0x1c7   : > { %v2206_v34 = vadd.f32 %v2205_v33, %v2204_v29  ;;  %v2317_v35 = vpop.f32.mrb[37].mxu1  ;;  %v2207_v36 = vpop.f32.mrb[38].mxu0 }
 0x1c8   : > { %v1504_v37 = vadd.f32 %v3120_v46, %v1465_v31  ;;  %v2318_v38 = vadd.f32 %v2317_v35, %v2316_v32  ;;  %v2319_v39 = vpop.f32.mrb[38].mxu1  ;;  %v2208_v40 = vpop.f32.mrb[39].mxu0  ;;  %v1535_v44 = vmax.f32 %v1503_v30, 0.0 }
 0x1c9   : > { %v2209_v42 = vadd.f32 %v2208_v40, %v2207_v36  ;;  %v2320_v43 = vpop.f32.mrb[39].mxu1 }
 0x1ca   : > { %v1536_v45 = vmax.f32 %v1504_v37, 0.0  ;;  %v1288_v47 = vadd.f32 %v2318_v38, %v2206_v34  ;;  %v2321_v48 = vadd.f32 %v2320_v43, %v2319_v39 }
 0x1cc   : > { %v2082_v49 = vpack.c.bf16 %v1536_v45, %v1535_v44  ;;  %v1466_v50 = vmul.f32 %v3118_v41, %v1288_v47  ;;  %v1291_v51 = vadd.f32 %v2321_v48, %v2209_v42 }
 0x1cd   : > { %v2210_v52 = vpop.f32.mrb[40].mxu0 }
 0x1ce   : > { %2126 = vst [vmem:[%s3128_s25 + $0x40] sm:$0xff] %v2082_v49   ;;  %v1505_v53 = vadd.f32 %v3120_v46, %v1466_v50  ;;  %v1467_v54 = vmul.f32 %v3118_v41, %v1291_v51  ;;  %v2322_v55 = vpop.f32.mrb[40].mxu1  ;;  %v2211_v56 = vpop.f32.mrb[41].mxu0 }
 0x1cf   : > { %v2212_v57 = vadd.f32 %v2211_v56, %v2210_v52  ;;  %v2323_v58 = vpop.f32.mrb[41].mxu1  ;;  %v2213_v59 = vpop.f32.mrb[42].mxu0 }
 0x1d0   : > { %v1506_v60 = vadd.f32 %v3120_v46, %v1467_v54  ;;  %v2324_v61 = vadd.f32 %v2323_v58, %v2322_v55  ;;  %v2325_v62 = vpop.f32.mrb[42].mxu1  ;;  %v2214_v63 = vpop.f32.mrb[43].mxu0  ;;  %v1537_v2 = vmax.f32 %v1505_v53, 0.0 }
 0x1d1   : > { %v2215_v0 = vadd.f32 %v2214_v63, %v2213_v59  ;;  %v2326_v1 = vpop.f32.mrb[43].mxu1 }
 0x1d2   : > { %v1538_v3 = vmax.f32 %v1506_v60, 0.0  ;;  %v1296_v4 = vadd.f32 %v2324_v61, %v2212_v57  ;;  %v2327_v5 = vadd.f32 %v2326_v1, %v2325_v62 }
 0x1d4   : > { %v2087_v6 = vpack.c.bf16 %v1538_v3, %v1537_v2  ;;  %v1468_v7 = vmul.f32 %v3118_v41, %v1296_v4  ;;  %v1299_v8 = vadd.f32 %v2327_v5, %v2215_v0 }
 0x1d5   : > { %v2216_v9 = vpop.f32.mrb[44].mxu0 }
 0x1d6   : > { %2127 = vst [vmem:[%s3128_s25 + $0x48] sm:$0xff] %v2087_v6   ;;  %v1507_v10 = vadd.f32 %v3120_v46, %v1468_v7  ;;  %v1469_v11 = vmul.f32 %v3118_v41, %v1299_v8  ;;  %v2328_v12 = vpop.f32.mrb[44].mxu1  ;;  %v2217_v13 = vpop.f32.mrb[45].mxu0 }
 0x1d7   : > { %v2218_v14 = vadd.f32 %v2217_v13, %v2216_v9  ;;  %v2329_v15 = vpop.f32.mrb[45].mxu1  ;;  %v2219_v16 = vpop.f32.mrb[46].mxu0 }
 0x1d8   : > { %v1508_v17 = vadd.f32 %v3120_v46, %v1469_v11  ;;  %v2330_v18 = vadd.f32 %v2329_v15, %v2328_v12  ;;  %v2331_v19 = vpop.f32.mrb[46].mxu1  ;;  %v2220_v20 = vpop.f32.mrb[47].mxu0  ;;  %v1539_v23 = vmax.f32 %v1507_v10, 0.0 }
 0x1d9   : > { %v2221_v21 = vadd.f32 %v2220_v20, %v2219_v16  ;;  %v2332_v22 = vpop.f32.mrb[47].mxu1 }
 0x1da   : > { %v1540_v24 = vmax.f32 %v1508_v17, 0.0  ;;  %v1304_v25 = vadd.f32 %v2330_v18, %v2218_v14  ;;  %v2333_v26 = vadd.f32 %v2332_v22, %v2331_v19 }
 0x1dc   : > { %v2092_v27 = vpack.c.bf16 %v1540_v24, %v1539_v23  ;;  %v1470_v28 = vmul.f32 %v3118_v41, %v1304_v25  ;;  %v1307_v29 = vadd.f32 %v2333_v26, %v2221_v21 }
 0x1dd   : > { %v2222_v30 = vpop.f32.mrb[48].mxu0 }
 0x1de   : > { %2128 = vst [vmem:[%s3128_s25 + $0x50] sm:$0xff] %v2092_v27   ;;  %v1509_v31 = vadd.f32 %v3120_v46, %v1470_v28  ;;  %v1471_v32 = vmul.f32 %v3118_v41, %v1307_v29  ;;  %v2334_v33 = vpop.f32.mrb[48].mxu1  ;;  %v2223_v34 = vpop.f32.mrb[49].mxu0 }
 0x1df   : > { %v2224_v35 = vadd.f32 %v2223_v34, %v2222_v30  ;;  %v2335_v36 = vpop.f32.mrb[49].mxu1  ;;  %v2225_v37 = vpop.f32.mrb[50].mxu0 }
 0x1e0   : > { %v1510_v38 = vadd.f32 %v3120_v46, %v1471_v32  ;;  %v2336_v39 = vadd.f32 %v2335_v36, %v2334_v33  ;;  %v2337_v40 = vpop.f32.mrb[50].mxu1  ;;  %v2226_v42 = vpop.f32.mrb[51].mxu0  ;;  %v1541_v45 = vmax.f32 %v1509_v31, 0.0 }
 0x1e1   : > { %v2227_v43 = vadd.f32 %v2226_v42, %v2225_v37  ;;  %v2338_v44 = vpop.f32.mrb[51].mxu1 }
 0x1e2   : > { %v1542_v47 = vmax.f32 %v1510_v38, 0.0  ;;  %v1312_v48 = vadd.f32 %v2336_v39, %v2224_v35  ;;  %v2339_v49 = vadd.f32 %v2338_v44, %v2337_v40 }
 0x1e4   : > { %v2097_v50 = vpack.c.bf16 %v1542_v47, %v1541_v45  ;;  %v1472_v51 = vmul.f32 %v3118_v41, %v1312_v48  ;;  %v1315_v52 = vadd.f32 %v2339_v49, %v2227_v43 }
 0x1e5   : > { %v2228_v53 = vpop.f32.mrb[52].mxu0 }
 0x1e6   : > { %2129 = vst [vmem:[%s3128_s25 + $0x58] sm:$0xff] %v2097_v50   ;;  %v1511_v54 = vadd.f32 %v3120_v46, %v1472_v51  ;;  %v1473_v55 = vmul.f32 %v3118_v41, %v1315_v52  ;;  %v2340_v56 = vpop.f32.mrb[52].mxu1  ;;  %v2229_v57 = vpop.f32.mrb[53].mxu0 }
 0x1e7   : > { %v2230_v58 = vadd.f32 %v2229_v57, %v2228_v53  ;;  %v2341_v59 = vpop.f32.mrb[53].mxu1  ;;  %v2231_v60 = vpop.f32.mrb[54].mxu0 }
 0x1e8   : > { %v1512_v61 = vadd.f32 %v3120_v46, %v1473_v55  ;;  %v2342_v62 = vadd.f32 %v2341_v59, %v2340_v56  ;;  %v2343_v63 = vpop.f32.mrb[54].mxu1  ;;  %v2232_v0 = vpop.f32.mrb[55].mxu0  ;;  %v1543_v3 = vmax.f32 %v1511_v54, 0.0 }
 0x1e9   : > { %v2233_v1 = vadd.f32 %v2232_v0, %v2231_v60  ;;  %v2344_v2 = vpop.f32.mrb[55].mxu1 }
 0x1ea   : > { %v1544_v4 = vmax.f32 %v1512_v61, 0.0  ;;  %v1320_v5 = vadd.f32 %v2342_v62, %v2230_v58  ;;  %v2345_v6 = vadd.f32 %v2344_v2, %v2343_v63 }
 0x1ec   : > { %v2102_v7 = vpack.c.bf16 %v1544_v4, %v1543_v3  ;;  %v1474_v8 = vmul.f32 %v3118_v41, %v1320_v5  ;;  %v1323_v9 = vadd.f32 %v2345_v6, %v2233_v1 }
 0x1ed   : > { %v2234_v10 = vpop.f32.mrb[56].mxu0 }
 0x1ee   : > { %2130 = vst [vmem:[%s3128_s25 + $0x60] sm:$0xff] %v2102_v7   ;;  %v1513_v11 = vadd.f32 %v3120_v46, %v1474_v8  ;;  %v1475_v12 = vmul.f32 %v3118_v41, %v1323_v9  ;;  %v2346_v13 = vpop.f32.mrb[56].mxu1  ;;  %v2235_v14 = vpop.f32.mrb[57].mxu0 }
 0x1ef   : > { %v2236_v15 = vadd.f32 %v2235_v14, %v2234_v10  ;;  %v2347_v16 = vpop.f32.mrb[57].mxu1  ;;  %v2237_v17 = vpop.f32.mrb[58].mxu0 }
 0x1f0   : > { %v1514_v18 = vadd.f32 %v3120_v46, %v1475_v12  ;;  %v2348_v19 = vadd.f32 %v2347_v16, %v2346_v13  ;;  %v2349_v20 = vpop.f32.mrb[58].mxu1  ;;  %v2238_v21 = vpop.f32.mrb[59].mxu0  ;;  %v1545_v24 = vmax.f32 %v1513_v11, 0.0 }
 0x1f1   : > { %v2239_v22 = vadd.f32 %v2238_v21, %v2237_v17  ;;  %v2350_v23 = vpop.f32.mrb[59].mxu1 }
 0x1f2   : > { %v1546_v25 = vmax.f32 %v1514_v18, 0.0  ;;  %v1328_v26 = vadd.f32 %v2348_v19, %v2236_v15  ;;  %v2351_v27 = vadd.f32 %v2350_v23, %v2349_v20 }
 0x1f4   : > { %v2107_v28 = vpack.c.bf16 %v1546_v25, %v1545_v24  ;;  %v1476_v29 = vmul.f32 %v3118_v41, %v1328_v26  ;;  %v1331_v30 = vadd.f32 %v2351_v27, %v2239_v22 }
 0x1f5   : > { %v2240_v31 = vpop.f32.mrb[60].mxu0 }
 0x1f6   : > { %2131 = vst [vmem:[%s3128_s25 + $0x68] sm:$0xff] %v2107_v28   ;;  %v1515_v32 = vadd.f32 %v3120_v46, %v1476_v29  ;;  %v1477_v33 = vmul.f32 %v3118_v41, %v1331_v30  ;;  %v2352_v34 = vpop.f32.mrb[60].mxu1  ;;  %v2241_v35 = vpop.f32.mrb[61].mxu0 }
 0x1f7   : > { %v2242_v36 = vadd.f32 %v2241_v35, %v2240_v31  ;;  %v2353_v37 = vpop.f32.mrb[61].mxu1  ;;  %v2243_v38 = vpop.f32.mrb[62].mxu0 }
 0x1f8   : > { %v1516_v39 = vadd.f32 %v3120_v46, %v1477_v33  ;;  %v2354_v40 = vadd.f32 %v2353_v37, %v2352_v34  ;;  %v2355_v42 = vpop.f32.mrb[62].mxu1  ;;  %v2244_v43 = vpop.f32.mrb[63].mxu0  ;;  %v1547_v47 = vmax.f32 %v1515_v32, 0.0 }
 0x1f9   : > { %v2245_v44 = vadd.f32 %v2244_v43, %v2243_v38  ;;  %v2356_v45 = vpop.f32.mrb[63].mxu1 }
 0x1fa   : > { %v1548_v48 = vmax.f32 %v1516_v39, 0.0  ;;  %v1336_v49 = vadd.f32 %v2354_v40, %v2242_v36  ;;  %v2357_v50 = vadd.f32 %v2356_v45, %v2355_v42 }
 0x1fc   : > { %v2112_v51 = vpack.c.bf16 %v1548_v48, %v1547_v47  ;;  %v1478_v52 = vmul.f32 %v3118_v41, %v1336_v49  ;;  %v1339_v53 = vadd.f32 %v2357_v50, %v2245_v44 }
 0x1fe   : > { %2132 = vst [vmem:[%s3128_s25 + $0x70] sm:$0xff] %v2112_v51   ;;  %v1517_v54 = vadd.f32 %v3120_v46, %v1478_v52  ;;  %v1479_v55 = vmul.f32 %v3118_v41, %v1339_v53 }
 0x200   : > { %v1518_v56 = vadd.f32 %v3120_v46, %v1479_v55  ;;  %v1549_v57 = vmax.f32 %v1517_v54, 0.0 }
 0x202   : > { %v1550_v58 = vmax.f32 %v1518_v56, 0.0 }
 0x204   : > { %v2117_v59 = vpack.c.bf16 %v1550_v58, %v1549_v57 }
 0x206   : > { %2133 = vst [vmem:[%s3128_s25 + $0x78] sm:$0xff] %v2117_v59  }
 0x207   : > { %2712 = shalt.err (!%p2709_p13)
}
 0x208   : > { %s2713_s29 = scalar_lea.hbm %s3209_s6, 2048  ;;  %s2717_s8 = scalar_lea.hbm %s3264_s4, 16384 }
 0x209   : > { %p2714_p4 = scmp.ne.s32.totalorder %s3209_s6, %s2713_s29  ;;  %p2718_p11 = scmp.lt.u32.totalorder %s3209_s6, %s3264_s4 }
 0x20a   : > { %p2719_p1 = scmp.lt.u32.totalorder %s2717_s8, %s2713_s29  ;;  %p2721_p12 = scmp.lt.u32.totalorder %s2713_s29, %s3209_s6 }
 0x20b   : > { %p2715_p2 = pnand %p2714_p4, %p2978_p0 }
 0x20c   : > { %p2720_p10 = por %p2719_p1, %p2718_p11 }
 0x20d   : > { %p2716_p8 = pneg %p2715_p2 }
 0x20e   : > { %p2722_p6 = por %p2721_p12, %p2720_p10 }
 0x210   : > { %p2723_p3 = pnand %p2722_p6, %p2716_p8 }
 0x212   : > { %2726 = shalt.err (!%p2723_p3)
}
 0x213   : > { %s2800_s25 = smov 64   ;;  %s2801_s27 = smov 4  }
 0x214   : > { %2372 = dma.vmem_to_hbm [thread:$0]  (%p2978_p0), %s3211_s24, 2048, %s3209_s6, %s1712_s7, %s2800_s25, %s2800_s25, %s2801_s27  }
 0x215 PF: > { %s3284_s22 = sld [smem:[#allocation16_spill]]  ;;  %p2399_p5 = scmp.ge.s32.totalorder %s2789_s20, 2 }
 0x216   : > { %s1741_s28 = sand.u32 1, %s2769_s15  }
 0x217   : > { %s1742_s12 = scalar_lea.sflag [#allocation5], %s1741_s28 }
 0x21b   : > { %p3285_p7 = scmp.ne.s32.totalorder %s3284_s22, 0 }
 0x21d   : > { %p2389_p9 = pnand %p2399_p5, %p3285_p7 }
 0x21f   : > { %2764 = dma.done.wait (!%p2389_p9), %s1742_s12, 2048  }
 0x220   : > { %2766 = vsyncadd (!%p2389_p9), %s1742_s12, 4294965248  ;;  %s22_s20 = sadd.s32 1, %s2789_s20   ;;  %s3286_s15 = smov %s2773_s16 }
 0x221   : > { %p19_p13 = scmp.ge.s32.totalorder %s22_s20, 10   ;;  %s3287_s16 = smov %s2777_s17 }
 0x222   : > { %s3288_s17 = smov %s2990_s11  ;;  %s3289_s18 = smov %s2785_s19 }
 0x223   : > { %s3290_s19 = smov %s3292_s26  ;;  %21 = sbr.rel (!%p19_p13) target bundleno = 8 (0x8), region = 104 }
 0x22a   :  { %1747 = vsyncpa [#allocation4], 1 }
 0x22b   :  { %1749 = vsyncpa [#allocation4 + $0x1], 1 }
 0x22c   :  { %1750 = vsyncpa [#allocation7], 1 }
 0x22d   :  { %1751 = vsyncpa [#allocation10], 1 }
 0x22e   :  { %1752 = vsyncpa [#allocation5], 1 }
 0x22f   :  { %1754 = vsyncpa [#allocation5 + $0x1], 1 }

</bundles_post_ra>
